<compile_context>
chip_gen: v7x
topology: tpu7x:2x2x1
jax: 0.10.0
libtpu: 0.0.40
codegen_flags: <defaults>
</compile_context>

<pallas_src>
import numpy as np
import jax
import jax.numpy as jnp
from jax.experimental import pallas as pl
from jax.experimental.pallas import tpu as pltpu

BN_EPS = 1e-3


def focus_kernel(x_ref, w_ref, b_ref, o_ref):
    """Fused (space-to-depth concat) 1x1 conv + folded-BN bias + SiLU.

    Transposed, lane-dense layout:
      x_ref: (1, 4C, TM)  bf16  quadrant-major channels (torch.cat order), pixels in lanes
      w_ref: (Cout, 4C)   bf16  BN scale folded in
      b_ref: (Cout, 1)    f32   folded BN bias
      o_ref: (1, Cout, TM)
    """
    # Single K=4C MXU matmul -> (Cout, TM), accumulated in f32.
    acc = jnp.dot(w_ref[...], x_ref[0], preferred_element_type=jnp.float32)
    o = acc + b_ref[...]                                  # lane-broadcast bias
    # SiLU: x * sigmoid(x); exp + approx reciprocal both use the EUP slot.
    o = o * pl.reciprocal(1.0 + jnp.exp(-o), approx=True)
    o_ref[0] = o.astype(o_ref.dtype)


def _row_tile(m, cap=2048):
    """Return (TM, padded_M).

    TM = m when m <= cap; else the largest multiple-of-128 divisor of m <= cap;
    else TM = cap and m is padded up (keeps per-step VMEM bounded on all gens).
    """
    if m <= cap:
        return m, m
    for t in range(cap - cap % 128, 127, -128):
        if m % t == 0:
            return t, m
    tm = cap
    return tm, ((m + tm - 1) // tm) * tm


def focus_forward(x_nchw, params, out_dtype=jnp.bfloat16):
    """Focus.forward on NCHW input using the Pallas kernel. Returns NCHW (N, Cout, H/2, W/2)."""
    wq, bias = params                                   # (Cout, 4C) bf16, (Cout, 1) f32
    N, C, H, W = x_nchw.shape
    assert H % 2 == 0 and W % 2 == 0, "Focus requires even spatial dims"
    Hh, Wh = H // 2, W // 2
    M = Hh * Wh
    C4 = 4 * C
    Cout = wq.shape[0]

    # Single wrapper-side relayout: NCHW -> (N, 4C, M) bf16.
    #   x[n, c, 2i+dh, 2j+dw] -> xq[n, q*C + c, i*Wh + j], q = dw*2 + dh,
    # i.e. exactly the torch.cat([tl, bl, tr, br], dim=1) channel order.
    x = x_nchw.reshape(N, C, Hh, 2, Wh, 2)              # (n, c, i, dh, j, dw)
    x = jnp.transpose(x, (0, 5, 3, 1, 2, 4))            # (n, dw, dh, c, i, j)
    xq = x.reshape(N, C4, M).astype(jnp.bfloat16)       # bf16 MXU operand

    TM, Mp = _row_tile(M)
    if Mp != M:
        xq = jnp.pad(xq, ((0, 0), (0, 0), (0, Mp - M)))

    out = pl.pallas_call(
        focus_kernel,
        out_shape=jax.ShapeDtypeStruct((N, Cout, Mp), out_dtype),
        grid=(N, Mp // TM),
        in_specs=[
            pl.BlockSpec((1, C4, TM), lambda n, m: (n, 0, m)),
            pl.BlockSpec((Cout, C4), lambda n, m: (0, 0)),
            pl.BlockSpec((Cout, 1), lambda n, m: (0, 0)),
        ],
        out_specs=pl.BlockSpec((1, Cout, TM), lambda n, m: (n, 0, m)),
        compiler_params=pltpu.CompilerParams(
            dimension_semantics=("parallel", "parallel")),
    )(xq, wq, bias)

    if Mp != M:
        out = out[:, :, :M]
    # Free reshape: pixels are already row-major (i*Wh + j). No transpose needed.
    return out.reshape(N, Cout, Hh, Wh)


def init_raw_params(key, in_channels, out_channels, dtype=jnp.float32):
    """Synthetic PyTorch-style params: Conv2d(4C->Cout, 1x1, bias=False) + BN2d(Cout)."""
    c4 = 4 * in_channels
    ks = jax.random.split(key, 5)
    w = 0.3 * jax.random.normal(ks[0], (out_channels, c4, 1, 1), dtype)
    gamma = 1.0 + 0.1 * jax.random.normal(ks[1], (out_channels,), dtype)
    beta = 0.1 * jax.random.normal(ks[2], (out_channels,), dtype)
    mean = 0.1 * jax.random.normal(ks[3], (out_channels,), dtype)
    var = jax.random.uniform(ks[4], (out_channels,), dtype, 0.5, 1.5)
    return w, gamma, beta, mean, var


def fold_params(raw):
    """Fold eval-mode BN into the conv weight (scale) + bias; weight kept as
    (Cout, 4C) bf16 with the 4C axis already in torch.cat channel order."""
    w, gamma, beta, mean, var = raw
    cout = w.shape[0]
    scale = gamma / jnp.sqrt(var + BN_EPS)
    bias = (beta - mean * scale).reshape(cout, 1).astype(jnp.float32)
    wq = (w[:, :, 0, 0] * scale[:, None]).astype(jnp.bfloat16)   # (Cout, 4C)
    return wq, bias


def ref_forward(x, raw):
    """Pure-JAX f32 reference reproducing Focus.forward (eval-mode BN)."""
    w, gamma, beta, mean, var = raw
    tl = x[..., ::2, ::2]
    bl = x[..., 1::2, ::2]
    tr = x[..., ::2, 1::2]
    br = x[..., 1::2, 1::2]
    xc = jnp.concatenate([tl, bl, tr, br], axis=1)        # (N, 4C, Hh, Wh)
    y = jnp.einsum('nchw,oc->nohw', xc, w[:, :, 0, 0])
    scale = gamma / jnp.sqrt(var + BN_EPS)
    bias = beta - mean * scale
    y = y * scale[None, :, None, None] + bias[None, :, None, None]
    return y * jax.nn.sigmoid(y)


if __name__ == "__main__":
    key = jax.random.PRNGKey(0)
    kx, kp = jax.random.split(key)
    N, Cin, H, W = 2, 4, 16, 16
    Cout = 8

    x = jax.random.normal(kx, (N, Cin, H, W), jnp.float32)   # NCHW, like PyTorch
    raw = init_raw_params(kp, Cin, Cout)
    kparams = fold_params(raw)

    out = jax.block_until_ready(focus_forward(x, kparams))
    assert out.shape == (N, Cout, H // 2, W // 2), out.shape

    ref = jax.block_until_ready(ref_forward(x, raw))
    # bf16 MXU operands + bf16 output + approx reciprocal vs. f32 reference
    # -> loosened tolerance (fine for a detector stem).
    np.testing.assert_allclose(np.asarray(out.astype(jnp.float32)),
                               np.asarray(ref), rtol=3e-2, atol=3e-2)
    print("KERNEL_OK")
</pallas_src>

<mosaic_0001>
module attributes {stable_mosaic.version = 11 : i64} {
  func.func @focus_kernel(%arg0: i32, %arg1: i32, %arg2: memref<1x16x64xbf16, #tpu.memory_space<vmem>>, %arg3: memref<8x16xbf16, #tpu.memory_space<vmem>>, %arg4: memref<8x1xf32, #tpu.memory_space<vmem>>, %arg5: memref<1x8x64xbf16, #tpu.memory_space<vmem>>) attributes {dimension_semantics = [#tpu.dimension_semantics<parallel>, #tpu.dimension_semantics<parallel>], iteration_bounds = array<i64: 2, 1>, scalar_prefetch = 0 : i64, scratch_operands = 0 : i64, tpu.core_type = #tpu.core_type<tc>, window_params = [{transform_indices = @transform_0, window_bounds = array<i64: 1, 16, 64>}, {pipeline_mode = #tpu.pipeline_mode<synchronous>, transform_indices = @transform_1, window_bounds = array<i64: 8, 16>}, {pipeline_mode = #tpu.pipeline_mode<synchronous>, transform_indices = @transform_2, window_bounds = array<i64: 8, 1>}, {transform_indices = @transform_3, window_bounds = array<i64: 1, 8, 64>}]} {
    %c0 = arith.constant 0 : index
    %c0_0 = arith.constant 0 : index
    %0 = vector.load %arg3[%c0, %c0_0] : memref<8x16xbf16, #tpu.memory_space<vmem>>, vector<8x16xbf16>
    %c0_1 = arith.constant 0 : index
    %c0_2 = arith.constant 0 : index
    %c0_3 = arith.constant 0 : index
    %1 = vector.load %arg2[%c0_1, %c0_2, %c0_3] : memref<1x16x64xbf16, #tpu.memory_space<vmem>>, vector<1x16x64xbf16>
    %2 = vector.shape_cast %1 : vector<1x16x64xbf16> to vector<16x64xbf16>
    %cst = arith.constant dense<0.000000e+00> : vector<8x64xf32>
    %3 = tpu.matmul %0, %2, %cst {dimension_numbers = #tpu.dot_dimension_numbers<[1], [0], [0], [1], [0, 0, 1, 1], [], []>} : vector<8x16xbf16>, vector<16x64xbf16>, vector<8x64xf32> -> vector<8x64xf32>
    %c0_4 = arith.constant 0 : index
    %c0_5 = arith.constant 0 : index
    %4 = vector.load %arg4[%c0_4, %c0_5] : memref<8x1xf32, #tpu.memory_space<vmem>>, vector<8x1xf32>
    %5 = vector.broadcast %4 : vector<8x1xf32> to vector<8x64xf32>
    %6 = arith.addf %3, %5 : vector<8x64xf32>
    %cst_6 = arith.constant 0.000000e+00 : f32
    %7 = vector.broadcast %cst_6 : f32 to vector<8x64xf32>
    %8 = arith.subf %7, %6 : vector<8x64xf32>
    %9 = math.exp %8 : vector<8x64xf32>
    %cst_7 = arith.constant 1.000000e+00 : f32
    %10 = vector.broadcast %cst_7 : f32 to vector<8x64xf32>
    %11 = arith.addf %10, %9 : vector<8x64xf32>
    %12 = tpu.reciprocal %11 {approx = true} : vector<8x64xf32> -> vector<8x64xf32>
    %13 = arith.mulf %6, %12 : vector<8x64xf32>
    %14 = arith.truncf %13 : vector<8x64xf32> to vector<8x64xbf16>
    %c0_8 = arith.constant 0 : index
    %c0_9 = arith.constant 0 : index
    %c0_10 = arith.constant 0 : index
    %15 = vector.load %arg5[%c0_8, %c0_9, %c0_10] : memref<1x8x64xbf16, #tpu.memory_space<vmem>>, vector<1x8x64xbf16>
    %16 = vector.shape_cast %15 : vector<1x8x64xbf16> to vector<8x64xbf16>
    %17 = vector.shape_cast %14 : vector<8x64xbf16> to vector<1x8x64xbf16>
    tpu.vector_store %arg5[%c0_8, %c0_9, %c0_10], %17 {strides = array<i32>} : memref<1x8x64xbf16, #tpu.memory_space<vmem>>, vector<1x8x64xbf16>,
    return
  }
  func.func @transform_0(%arg0: i32, %arg1: i32) -> (i32, i32, i32) {
    %c0_i32 = arith.constant 0 : i32
    %c0_i32_0 = arith.constant 0 : i32
    return %arg0, %c0_i32, %arg1 : i32, i32, i32
  }
  func.func @transform_1(%arg0: i32, %arg1: i32) -> (i32, i32) {
    %c0_i32 = arith.constant 0 : i32
    %c0_i32_0 = arith.constant 0 : i32
    %c0_i32_1 = arith.constant 0 : i32
    return %c0_i32, %c0_i32_0 : i32, i32
  }
  func.func @transform_2(%arg0: i32, %arg1: i32) -> (i32, i32) {
    %c0_i32 = arith.constant 0 : i32
    %c0_i32_0 = arith.constant 0 : i32
    %c0_i32_1 = arith.constant 0 : i32
    return %c0_i32, %c0_i32_0 : i32, i32
  }
  func.func @transform_3(%arg0: i32, %arg1: i32) -> (i32, i32, i32) {
    %c0_i32 = arith.constant 0 : i32
    %c0_i32_0 = arith.constant 0 : i32
    return %arg0, %c0_i32, %arg1 : i32, i32, i32
  }
}

</mosaic_0001>

<bundles_post_ra>
// kernel: tpu_custom_call.1
= control target key start
LH: loop header
LB: loop body
LE: loop exit
PB: predicated region body
PF: predicated region fallthrough
CT: control target
= control target key end

     0   :  { %8 = vsyncpa [#allocation3], 0  ;;  %s790_s0 = inlined_call_operand.hbm [shape: bf16[2,16,64], index: 0, kind: input, shape index: {}]   ;;  %s791_s1 = inlined_call_operand.vmem [shape: bf16[8,16], index: 1, kind: input, shape index: {}]   ;;  %s792_s2 = inlined_call_operand.vmem [shape: f32[8,1], index: 2, kind: input, shape index: {}]   ;;  %s793_s3 = inlined_call_operand.hbm [shape: bf16[2,8,64], index: 3, kind: output, shape index: {}]  }
   0x1   :  { %10 = vsyncpa [#allocation3 + $0x1], 0 }
   0x2   :  { %11 = vsyncpa [#allocation4], 0 }
   0x3   :  { %13 = vsyncpa [#allocation4 + $0x1], 0  ;;  %s610_s12 = smov 0   ;;  %s612_s13 = smov 0  }
   0x4   :  { %s614_s14 = smov 0   ;;  %s616_s15 = smov 0  }
   0x5   :  { %s618_s16 = smov 0   ;;  %s620_s17 = smov 0  }
   0x6 LB: > { %s371_s18 = sadd.s32 4294967295, %s581_s17   ;;  %s372_s19 = sadd.s32 4294967294, %s581_s17   ;;  %s581_s17 = sphi %s620_s17, %s19_s17   ;;  %s577_s16 = sphi %s618_s16, %s808_s16   ;;  %s573_s15 = sphi %s616_s15, %s807_s15   ;;  %s569_s14 = sphi %s614_s14, %s806_s14   ;;  %s565_s13 = sphi %s612_s13, %s805_s13   ;;  %s561_s12 = sphi %s610_s12, %s804_s12  }
   0x7   : > { %s31_s20 = sadd.s32 1, %s577_s16  ;;  %s40_s21 = sadd.s32 1, %s569_s14 }
   0x8   : > { %p33_p0 = scmp.ge.s32.totalorder %s31_s20, 2  ;;  %p47_p1 = scmp.ne.s32.totalorder %s569_s14, %s565_s13 }
   0x9   : > { %p48_p2 = scmp.eq.s32.totalorder %s581_s17, 0  ;;  %p53_p3 = scmp.ne.s32.totalorder %s565_s13, %s561_s12 }
   0xa   : > { %s810_s20 = smov (%p33_p0, %s31_s20), 0  ;;  %p54_p5 = scmp.eq.s32.totalorder %s371_s18, 0 }
   0xb   : > { %p651_p4 = por %p48_p2, %p47_p1  ;;  %s35_s23 = ssub.s32 %s577_s16, %s810_s20 }
   0xc   : > { %p121_p6 = scmp.eq.s32.totalorder %s371_s18, 1  ;;  %p38_p7 = scmp.eq.s32.totalorder %s35_s23, 0 }
   0xd   : > { %p657_p8 = por %p54_p5, %p53_p3  ;;  %p127_p10 = scmp.eq.s32.totalorder %s372_s19, 1 }
   0xe   : > { %p661_p9 = por %p121_p6, %p47_p1  ;;  %p408_p13 = scmp.lt.s32.totalorder %s581_s17, 2 }
   0xf   : > { %s666_s26 = scalar_select %p38_p7, %s569_s14, %s40_s21  }
  0x10   : > { %s797_s25 = scalar_select %p661_p9, 1, 0 }
  0x11   : > { %p668_p11 = por %p127_p10, %p53_p3  ;;  %s153_s28 = sand.u32 1, %s569_s14  }
  0x12   : > { %s375_s29 = sshll.u32 %s153_s28, 3  ;;  %s387_s30 = sshll.u32 %s577_s16, 7 }
  0x13   : > { %s798_s27 = scalar_select %p668_p11, 1, 0 }
  0x14   : > { %s679_s6 = scalar_lea.hbm %s790_s0, %s387_s30  ;;  %s157_s7 = scalar_lea.vmem [#allocation2], %s375_s29 }
  0x15   : > { %s165_s8 = sshll.u32 %s157_s7, 4  ;;  %p685_p0 = pnand %p408_p13, %p651_p4  ;;  %s681_s8 = int_to_ptr.vmem [resolvable:$true] %s165_s8 }
  0x16   : > { %s690_s10 = scalar_lea.sflag [#allocation3], %s153_s28  ;;  %s469_s11 = scalar_lea.hbm %s679_s6, 128 }
  0x17   : > { %p470_p2 = scmp.ne.s32.totalorder %s679_s6, %s469_s11  ;;  %p471_p3 = pneg %p685_p0 }
  0x18   : > { %s474_s21 = scalar_lea.hbm %s790_s0, 256  ;;  %p475_p4 = scmp.lt.u32.totalorder %s679_s6, %s790_s0 }
  0x19   : > { %p472_p5 = pnand %p471_p3, %p470_p2  ;;  %p476_p7 = scmp.lt.u32.totalorder %s474_s21, %s469_s11 }
  0x1a   : > { %p478_p13 = scmp.lt.u32.totalorder %s469_s11, %s679_s6 }
  0x1b   : > { %p473_p6 = pneg %p472_p5  ;;  %p477_p10 = por %p476_p7, %p475_p4 }
  0x1d   : > { %p479_p12 = por %p478_p13, %p477_p10 }
  0x1f   : > { %p480_p1 = pnand %p479_p12, %p473_p6 }
  0x21   : > { %483 = shalt.err (!%p480_p1)
}
  0x22   : > { %s484_s28 = scalar_lea.vmem %s681_s8, 128  ;;  %s583_s29 = smov [#allocation2]  }
  0x23   : > { %p485_p2 = scmp.ne.s32.totalorder %s681_s8, %s484_s28  ;;  %s489_s30 = sshll.u32 %s583_s29, 4  ;;  %s490_s30 = int_to_ptr.vmem [resolvable:$false] %s489_s30 }
  0x24   : > { %s491_s4 = scalar_lea.vmem %s490_s30, 256  ;;  %p492_p9 = scmp.lt.s32.totalorder %s681_s8, %s490_s30 }
  0x25   : > { %p487_p5 = pnand %p485_p2, %p471_p3  ;;  %p493_p4 = scmp.lt.s32.totalorder %s491_s4, %s484_s28 }
  0x27   : > { %p488_p11 = pneg %p487_p5  ;;  %p494_p7 = por %p493_p4, %p492_p9 }
  0x29   : > { %p495_p10 = pnand %p494_p7, %p488_p11 }
  0x2b   : > { %498 = shalt.err (!%p495_p10)
}
  0x2c   : > { %s584_s5 = smov 64   ;;  %s585_s7 = smov 4  }
  0x2d   : > { %403 = dma.hbm_to_vmem [thread:$0]  (!%p685_p0), %s679_s6, 128, %s681_s8, %s690_s10, %s584_s5, %s584_s5, %s585_s7  }
  0x2e   : > { %p173_p12 = scmp.lt.s32.totalorder %s581_s17, 3  ;;  %p800_p1 = scmp.ge.s32.totalorder %s581_s17, 1 }
  0x30   : > { %p174_p3 = pnand %p800_p1, %p173_p12 }
  0x31   : > { %s722_s11 = sand.u32 (!%p174_p3), 1, %s565_s13  }
  0x32   : > { %177 = sbr.rel (%p174_p3) target bundleno = 323 (0x143), region = 32  ;;  %s379_s18 = sshll.u32 (!%p174_p3), %s722_s11, 3 }
  0x33   : > { %s180_s19 = scalar_lea.sflag (!%p174_p3), [#allocation3], %s722_s11  ;;  %s183_s21 = scalar_lea.vmem (!%p174_p3), [#allocation2], %s379_s18 }
  0x39   : > { %552 = dma.done.wait (%p657_p8), %s180_s19, 128  }
  0x3a   : > { %554 = vsyncadd (%p657_p8), %s180_s19, 4294967168  ;;  %v586_v0 = vmov 0.0   ;;  %vm587_vm0 = vmmov 0   ;;  %v588_v1 = vmov 0   ;;  %v464_v2 = vld [vmem:[%s183_s21] sm:$0xff]   ;;  %vm222_vm1 = vcmask 130048  }
  0x3b   : > { %390 = vmatprep.subr.bf16.mxu0 %v586_v0  ;;  %392 = vmatprep.mubr.msk.bf16.mxu0 %vm587_vm0, %v586_v0  ;;  %v210_v3 = vld [vmem:[%s792_s2] sm:$0xff]  ;;  %s380_s24 = sshll.u32 %s722_s11, 2  ;;  %s384_s22 = sshll.u32 %s573_s15, 6  ;;  %vm273_vm2 = vcmask 519168  }
  0x3c   : > { %463 = vset.pattern.permute.xlu0 %v588_v1  ;;  %391 = vmatpush3.bf16.msra.mxu0 %v464_v2  ;;  %v207_v4 = vld [vmem:[%s791_s1] sm:$0xf]  ;;  %s205_s23 = scalar_lea.vmem [#allocation5], %s380_s24  ;;  %s741_s4 = scalar_lea.hbm %s793_s3, %s384_s22 }
  0x3d   : > { %213 = vperm.xlu0 %463, %v210_v3   ;;  %s290_s28 = sshll.u32 %s205_s23, 4  ;;  %s276_s5 = scalar_lea.sflag [#allocation4], %s722_s11  ;;  %s743_s28 = int_to_ptr.vmem [resolvable:$true] %s290_s28 }
  0x3e   : > { %s499_s7 = scalar_lea.vmem %s743_s28, 64  ;;  %p801_p9 = scmp.ne.s32.totalorder %s797_s25, 0 }
  0x3f   : > { %393 = vmatmul.mubr.msk.bf16.vlgmr.msra.gmra.mrb[0].mxu0 %vm222_vm1, %v207_v4  ;;  %p500_p8 = scmp.ne.s32.totalorder %s743_s28, %s499_s7  ;;  %s589_s15 = smov [#allocation5]  }
  0x40   : > { %s503_s18 = sshll.u32 %s589_s15, 4  ;;  %s504_s18 = int_to_ptr.vmem [resolvable:$false] %s503_s18 }
  0x41   : > { %p501_p11 = pnand %p500_p8, %p801_p9  ;;  %s505_s19 = scalar_lea.vmem %s504_s18, 128 }
  0x42   : > { %p506_p6 = scmp.lt.s32.totalorder %s743_s28, %s504_s18  ;;  %p507_p13 = scmp.lt.s32.totalorder %s505_s19, %s499_s7 }
  0x43   : > { %p502_p0 = pneg %p501_p11 }
  0x44   : > { %p508_p2 = por %p507_p13, %p506_p6 }
  0x46   : > { %p509_p5 = pnand %p508_p2, %p502_p0 }
  0xbc   : > { %v214_v5 = vpop.permute.xlu0 %213 }
 0x112   : > { %v260_v6 = vpop.f32.mrb[0].mxu0 }
 0x113   : > { %v261_v7 = vadd.f32 %v260_v6, %v214_v5  ;;  %v394_v8 = vpop.f32.mrb[1].mxu0 }
 0x114   : > { %v263_v9 = vpop.f32.mrb[2].mxu0 }
 0x115   : > { %v266_v10 = vsub.f32 0.0, %v261_v7  ;;  %v395_v11 = vpop.f32.mrb[3].mxu0 }
 0x117   : > { %v267_v12 = vmul.f32 1.442695, %v266_v10 }
 0x119   : > { %465 = vpow2.f32 %v267_v12 }
 0x123   : > { %v466_v13 = vpop.eup %465 }
 0x124   : > { %v269_v14 = vadd.f32 1.0, %v466_v13 }
 0x126   : > { %467 = vrcp.f32 %v269_v14 }
 0x130   : > { %v468_v15 = vpop.eup %467 }
 0x131   : > { %v271_v16 = vmul.f32 %v468_v15, %v261_v7 }
 0x133   : > { %v272_v17 = vpack.c.bf16 %v271_v16, %v271_v16 }
 0x135   : > { %274 = vst.msk [vmem:[%s205_s23] sm:$0xf] %vm273_vm2, %v272_v17 }
 0x136   : > { %512 = shalt.err (!%p509_p5)
}
 0x137   : > { %s513_s11 = scalar_lea.hbm %s741_s4, 64  ;;  %s517_s8 = scalar_lea.hbm %s793_s3, 128 }
 0x138   : > { %p514_p4 = scmp.ne.s32.totalorder %s741_s4, %s513_s11  ;;  %p518_p12 = scmp.lt.u32.totalorder %s741_s4, %s793_s3 }
 0x139   : > { %p519_p1 = scmp.lt.u32.totalorder %s517_s8, %s513_s11  ;;  %p521_p8 = scmp.lt.u32.totalorder %s513_s11, %s741_s4 }
 0x13a   : > { %p515_p7 = pnand %p514_p4, %p801_p9 }
 0x13b   : > { %p520_p3 = por %p519_p1, %p518_p12 }
 0x13c   : > { %p516_p10 = pneg %p515_p7 }
 0x13d   : > { %p522_p11 = por %p521_p8, %p520_p3 }
 0x13f   : > { %p523_p0 = pnand %p522_p11, %p516_p10 }
 0x141   : > { %526 = shalt.err (!%p523_p0)
}
 0x142   : > { %398 = dma.vmem_to_hbm [thread:$0]  (%p801_p9), %s743_s28, 64, %s741_s4, %s276_s5  }
 0x143 PF: > { %s302_s24 = sand.u32 1, %s561_s12   ;;  %p802_p6 = scmp.ne.s32.totalorder %s798_s27, 0 }
 0x144   : > { %p803_p13 = scmp.ge.s32.totalorder %s581_s17, 2  ;;  %s303_s22 = scalar_lea.sflag [#allocation4], %s302_s24 }
 0x146   : > { %p405_p2 = pnand %p803_p13, %p802_p6 }
 0x148   : > { %556 = dma.done.wait (!%p405_p2), %s303_s22, 64  }
 0x149   : > { %558 = vsyncadd (!%p405_p2), %s303_s22, 4294967232  ;;  %s19_s17 = sadd.s32 1, %s581_s17   ;;  %s804_s12 = smov %s565_s13 }
 0x14a   : > { %p16_p5 = scmp.ge.s32.totalorder %s19_s17, 4   ;;  %s805_s13 = smov %s569_s14 }
 0x14b   : > { %s806_s14 = smov %s666_s26  ;;  %s807_s15 = smov %s577_s16 }
 0x14c   : > { %s808_s16 = smov %s810_s20  ;;  %18 = sbr.rel (!%p16_p5) target bundleno = 6 (0x6), region = 77 }
 0x153   :  { %308 = vsyncpa [#allocation3], 1 }
 0x154   :  { %310 = vsyncpa [#allocation3 + $0x1], 1 }
 0x155   :  { %311 = vsyncpa [#allocation4], 1 }
 0x156   :  { %313 = vsyncpa [#allocation4 + $0x1], 1 }

</bundles_post_ra>
